<compile_context>
chip_gen: v7x
topology: tpu7x:2x2x1
jax: 0.10.0
libtpu: 0.0.40
codegen_flags: <defaults>
</compile_context>

<pallas_src>
import functools

import jax
import jax.numpy as jnp
from jax.experimental import pallas as pl
from jax.experimental.pallas import tpu as pltpu

_VMEM_LIMIT = 48 * 1024 * 1024  # scoped-VMEM request; below physical on v5e/v6e/v7x


# ------------------- pass 1: global avg/max pool + CWR MLP -------------------

def _cwr_pool_kernel(x_ref, f_ref, wc1_ref, bc1_ref, wc2_ref, bc2_ref,
                     att_ref, sum_sc, max_sc, *, inv_hw):
    i = pl.program_id(1)

    @pl.when(i == 0)
    def _():
        sum_sc[...] = jnp.zeros_like(sum_sc)
        max_sc[...] = jnp.full_like(max_sc, -jnp.inf)

    s = x_ref[...].astype(jnp.float32) + f_ref[...].astype(jnp.float32)   # (C, RW)
    sum_sc[...] += jnp.sum(s, axis=1, keepdims=True)
    max_sc[...] = jnp.maximum(max_sc[...], jnp.max(s, axis=1, keepdims=True))

    @pl.when(i == pl.num_programs(1) - 1)
    def _():
        # merged MLP: gap and gmp share weights -> one (Cr,C)@(C,2) matmul per layer
        g = jnp.concatenate([sum_sc[...] * inv_hw, max_sc[...]], axis=1)  # (C, 2)
        h = jax.nn.relu(jnp.dot(wc1_ref[...], g,
                                preferred_element_type=jnp.float32) + bc1_ref[...])
        z = jnp.dot(wc2_ref[...], h,
                    preferred_element_type=jnp.float32) + bc2_ref[...]    # (C, 2)
        att_ref[...] = jax.nn.sigmoid(z[:, 0:1] + z[:, 1:2])              # (C, 1)


# ------------------- pass 2: SWR convs + combine, per H-strip -------------------

def _sscr_strip_kernel(x_ref, f_ref, xt_ref, xb_ref, ft_ref, fb_ref, ca_ref,
                       ws1_ref, bs1_ref, w12_ref, b12_ref, w22_ref, b22_ref,
                       o_ref, *, W, R, top_off):
    C = x_ref.shape[0]
    RW = R * W
    EXT = RW + 2 * W
    cdt = ws1_ref.dtype                       # MXU operand dtype (bf16 by default)

    i = pl.program_id(1)
    ns = pl.num_programs(1)
    vt = (i > 0).astype(jnp.float32)          # top halo row lies inside the image?
    vb = (i < ns - 1).astype(jnp.float32)     # bottom halo row lies inside the image?

    f = f_ref[...].astype(jnp.float32)
    s = x_ref[...].astype(jnp.float32) + f                                 # (C, RW)

    # halo rows of s (row above / below the strip), zeroed at the image border
    s_top = (xt_ref[:, top_off:top_off + W].astype(jnp.float32)
             + ft_ref[:, top_off:top_off + W].astype(jnp.float32)) * vt    # (C, W)
    s_bot = (xb_ref[:, 0:W].astype(jnp.float32)
             + fb_ref[:, 0:W].astype(jnp.float32)) * vb                    # (C, W)

    # extended strip [halo_top | strip | halo_bot]: every (3,1) tap is a lane shift
    s_ext = jnp.concatenate([s_top, s, s_bot], axis=1).astype(cdt)         # (C, EXT)

    # hoisted boundary masks: one iota, single compare each, shape (1, EXT)
    lane = jax.lax.broadcasted_iota(jnp.int32, (1, EXT), 1)
    wloc = lane % W
    m_wm = wloc >= 1                   # valid output cols for the w-1 tap
    m_wp = wloc <= W - 2               # valid output cols for the w+1 tap
    # zero the halo rows of relu(conv(s)) when they fall outside the image (conv_2_2
    # zero-pads its *input*, i.e. the conv_2_1 activation, not s)
    gate = jnp.where(lane < W, vt, jnp.where(lane >= W + RW, vb, 1.0))     # (1, EXT)

    zW = jnp.zeros((C, W), cdt)
    z1 = jnp.zeros((C, 1), cdt)
    zero = jnp.zeros((), cdt)

    def shift(v, d, zpad):             # out[:, q] = v[:, q + d], zero at array ends
        if d > 0:
            return jnp.concatenate([v[:, d:], zpad], axis=1)
        return jnp.concatenate([zpad, v[:, :d]], axis=1)

    def wshift(v, d):                  # (1,3) conv taps: shift within each image row
        return jnp.where(m_wp if d > 0 else m_wm, shift(v, d, z1), zero)

    def hshift(v, d):                  # (3,1) conv taps: shift by whole rows
        return shift(v, d * W, zW)

    # ---- SWR stage 1: conv_1_1 (3,1) and conv_2_1 (1,3) merged into M=2C matmuls ----
    taps1 = (hshift(s_ext, -1), wshift(s_ext, -1), s_ext,
             wshift(s_ext, 1), hshift(s_ext, 1))
    u = jnp.dot(ws1_ref[0], taps1[0], preferred_element_type=jnp.float32)
    for t in range(1, 5):
        u = u + jnp.dot(ws1_ref[t], taps1[t], preferred_element_type=jnp.float32)
    u = jax.nn.relu(u + bs1_ref[...]) * gate                               # (2C, EXT)
    a = u[:C].astype(cdt)                                                  # relu(conv_1_1(s))
    b = u[C:].astype(cdt)                                                  # relu(conv_2_1(s))

    # ---- SWR stage 2: per-tap accumulation (no concat) ----
    a2 = (jnp.dot(w12_ref[0], wshift(a, -1), preferred_element_type=jnp.float32)
          + jnp.dot(w12_ref[1], a, preferred_element_type=jnp.float32)
          + jnp.dot(w12_ref[2], wshift(a, 1), preferred_element_type=jnp.float32))
    a2 = jax.nn.relu(a2 + b12_ref[...])
    b2 = (jnp.dot(w22_ref[0], hshift(b, -1), preferred_element_type=jnp.float32)
          + jnp.dot(w22_ref[1], b, preferred_element_type=jnp.float32)
          + jnp.dot(w22_ref[2], hshift(b, 1), preferred_element_type=jnp.float32))
    b2 = jax.nn.relu(b2 + b22_ref[...])
    sp = jax.nn.sigmoid(a2 + b2)[:, W:W + RW]                              # (C, RW)

    # ---- combine: CWR(s) * SWR(s) + f ----
    ca = ca_ref[...]                                                       # (C, 1)
    out = (s * ca) * (s * sp) + f
    o_ref[...] = out.astype(o_ref.dtype)


# ----------------------------- wrapper -----------------------------

def _pick_strip_rows(H, W, C, in_itemsize, max_lanes=2048, vmem_budget=20 << 20):
    """Largest H-strip (rows) whose lane-dense block fits the VMEM budget."""
    per_lane = C * (6 * in_itemsize + 48)          # blocks (double-buffered) + f32 temps
    lane_cap = max(128, min(max_lanes, vmem_budget // max(per_lane, 1)))
    feasible = []
    for R in range(1, H + 1):
        if H % R:
            continue
        if R < H:
            if (R * W) % 128:                      # lane-dense strip blocks
                continue
            if not (W % 128 == 0 or 128 % W == 0):  # expressible halo block
                continue
        feasible.append(R)
    under = [R for R in feasible if R * W <= lane_cap]
    if under:
        return max(under)
    return min(feasible)
    # TODO(synk): W-direction tiling (with a lane halo) for very wide rows / huge C.


def sscr_forward(x_nchw, f_nchw, params, *, strip_rows=None):
    """SSCR forward.  x, f are NCHW (PyTorch convention), same shape & dtype."""
    assert x_nchw.shape == f_nchw.shape and x_nchw.dtype == f_nchw.dtype
    N, C, H, W = x_nchw.shape
    HW = H * W

    R = strip_rows if strip_rows is not None else _pick_strip_rows(
        H, W, C, x_nchw.dtype.itemsize)
    assert H % R == 0, "strip_rows must divide H"
    RW = R * W
    S = H // R
    if S > 1:
        assert RW % 128 == 0, "strip_rows*W must be a multiple of 128"
        assert W % 128 == 0 or 128 % W == 0, "halo block needs W | 128 or 128 | W"
        halo_blk = W if W % 128 == 0 else 128
    else:
        halo_blk = 128 if (HW % 128 == 0 and W <= 128) else HW
    top_off = halo_blk - W
    n_hb = HW // halo_blk
    rwb = RW // halo_blk

    # Free (contiguous) reshapes -- no HBM transpose passes.
    x2 = x_nchw.reshape(N, C, HW)
    f2 = f_nchw.reshape(N, C, HW)

    Cr = params["w_c1"].shape[0]

    # ---- pass 1: global avg/max pool + CWR MLP -> channel attention (N, C, 1) ----
    ch_att = pl.pallas_call(
        functools.partial(_cwr_pool_kernel, inv_hw=1.0 / HW),
        out_shape=jax.ShapeDtypeStruct((N, C, 1), jnp.float32),
        grid=(N, S),
        in_specs=[
            pl.BlockSpec((None, C, RW), lambda n, i: (n, 0, i)),
            pl.BlockSpec((None, C, RW), lambda n, i: (n, 0, i)),
            pl.BlockSpec((Cr, C), lambda n, i: (0, 0)),
            pl.BlockSpec((Cr, 1), lambda n, i: (0, 0)),
            pl.BlockSpec((C, Cr), lambda n, i: (0, 0)),
            pl.BlockSpec((C, 1), lambda n, i: (0, 0)),
        ],
        out_specs=pl.BlockSpec((None, C, 1), lambda n, i: (n, 0, 0)),
        scratch_shapes=[pltpu.VMEM((C, 1), jnp.float32),
                        pltpu.VMEM((C, 1), jnp.float32)],
        compiler_params=pltpu.CompilerParams(
            dimension_semantics=("parallel", "arbitrary"),
            vmem_limit_bytes=_VMEM_LIMIT),
    )(x2, f2, params["w_c1"], params["b_c1"], params["w_c2"], params["b_c2"])

    # ---- pass 2: fused SWR convs + combine, tiled over (batch, H-strip) ----
    strip_spec = pl.BlockSpec((None, C, RW), lambda n, i: (n, 0, i))

    def top_map(n, i):
        return (n, 0, jnp.maximum(i * rwb - 1, 0))

    def bot_map(n, i):
        return (n, 0, jnp.minimum((i + 1) * rwb, n_hb - 1))

    halo_t = pl.BlockSpec((None, C, halo_blk), top_map)
    halo_b = pl.BlockSpec((None, C, halo_blk), bot_map)

    kern = functools.partial(_sscr_strip_kernel, W=W, R=R, top_off=top_off)
    out = pl.pallas_call(
        kern,
        out_shape=jax.ShapeDtypeStruct((N, C, HW), x_nchw.dtype),
        grid=(N, S),
        in_specs=[
            strip_spec, strip_spec,                                  # x, f strips
            halo_t, halo_b, halo_t, halo_b,                          # x / f halo rows
            pl.BlockSpec((None, C, 1), lambda n, i: (n, 0, 0)),      # channel attention
            pl.BlockSpec((5, 2 * C, C), lambda n, i: (0, 0, 0)),     # merged stage-1 W
            pl.BlockSpec((2 * C, 1), lambda n, i: (0, 0)),
            pl.BlockSpec((3, C, C), lambda n, i: (0, 0, 0)),         # conv_1_2 taps
            pl.BlockSpec((C, 1), lambda n, i: (0, 0)),
            pl.BlockSpec((3, C, C), lambda n, i: (0, 0, 0)),         # conv_2_2 taps
            pl.BlockSpec((C, 1), lambda n, i: (0, 0)),
        ],
        out_specs=pl.BlockSpec((None, C, RW), lambda n, i: (n, 0, i)),
        compiler_params=pltpu.CompilerParams(
            dimension_semantics=("parallel", "parallel"),
            vmem_limit_bytes=_VMEM_LIMIT),
    )(x2, f2, x2, x2, f2, f2, ch_att,
      params["w_s1"], params["b_s1"], params["w_12"], params["b_12"],
      params["w_22"], params["b_22"])

    return out.reshape(N, C, H, W)


# ----------------------------- reference (pure JAX) -----------------------------

def _conv_nchw(x, w, pad):
    return jax.lax.conv_general_dilated(
        x, w, window_strides=(1, 1), padding=pad,
        dimension_numbers=("NCHW", "OIHW", "NCHW"),
        precision=jax.lax.Precision.HIGHEST)


def ref_sscr(x, f, p, *, k=3):
    pd = k // 2
    s = x + f
    # CWR
    gap = jnp.mean(s, axis=(2, 3))
    gmp = jnp.max(s, axis=(2, 3))

    def mlp(g):
        h = jax.nn.relu(g @ p["wc1"].T + p["bc1"])
        return h @ p["wc2"].T + p["bc2"]

    ch = jax.nn.sigmoid(mlp(gap) + mlp(gmp))[:, :, None, None]
    cwr = s * ch

    # SWR
    def add_b(y, b):
        return y + b[None, :, None, None]

    x1 = jax.nn.relu(add_b(_conv_nchw(s, p["w11"], [(pd, pd), (0, 0)]), p["b11"]))
    x1 = jax.nn.relu(add_b(_conv_nchw(x1, p["w12"], [(0, 0), (pd, pd)]), p["b12"]))
    x2 = jax.nn.relu(add_b(_conv_nchw(s, p["w21"], [(0, 0), (pd, pd)]), p["b21"]))
    x2 = jax.nn.relu(add_b(_conv_nchw(x2, p["w22"], [(pd, pd), (0, 0)]), p["b22"]))
    swr = s * jax.nn.sigmoid(x1 + x2)

    return cwr * swr + f


# ----------------------------- param init / packing -----------------------------

def init_params(key, C, k=3, r=16, mxu_dtype=jnp.bfloat16):
    assert k == 3, "SSCR uses kernel_size=3"
    Cr = max(C // r, 1)
    ks = jax.random.split(key, 12)
    w11 = 0.05 * jax.random.normal(ks[0], (C, C, k, 1), jnp.float32)   # (3,1) over H
    b11 = 0.05 * jax.random.normal(ks[1], (C,), jnp.float32)
    w12 = 0.05 * jax.random.normal(ks[2], (C, C, 1, k), jnp.float32)   # (1,3) over W
    b12 = 0.05 * jax.random.normal(ks[3], (C,), jnp.float32)
    w21 = 0.05 * jax.random.normal(ks[4], (C, C, 1, k), jnp.float32)   # (1,3) over W
    b21 = 0.05 * jax.random.normal(ks[5], (C,), jnp.float32)
    w22 = 0.05 * jax.random.normal(ks[6], (C, C, k, 1), jnp.float32)   # (3,1) over H
    b22 = 0.05 * jax.random.normal(ks[7], (C,), jnp.float32)
    wc1 = 0.2 * jax.random.normal(ks[8], (Cr, C), jnp.float32)
    bc1 = 0.1 * jax.random.normal(ks[9], (Cr,), jnp.float32)
    wc2 = 0.2 * jax.random.normal(ks[10], (C, Cr), jnp.float32)
    bc2 = 0.1 * jax.random.normal(ks[11], (C,), jnp.float32)

    # --- packing for the Pallas kernels ---
    # tap t of a size-3 kernel corresponds to spatial offset d = t - 1.
    w11t = [w11[:, :, t, 0] for t in range(k)]
    w21t = [w21[:, :, 0, t] for t in range(k)]
    w12t = [w12[:, :, 0, t] for t in range(k)]
    w22t = [w22[:, :, t, 0] for t in range(k)]
    z = jnp.zeros((C, C), jnp.float32)
    # merged stage-1 weights; shift order [h-1, w-1, center, w+1, h+1];
    # rows 0..C-1 produce conv_1_1, rows C..2C-1 produce conv_2_1.
    w_s1 = jnp.stack([
        jnp.concatenate([w11t[0], z], axis=0),
        jnp.concatenate([z, w21t[0]], axis=0),
        jnp.concatenate([w11t[1], w21t[1]], axis=0),
        jnp.concatenate([z, w21t[2]], axis=0),
        jnp.concatenate([w11t[2], z], axis=0),
    ], axis=0).astype(mxu_dtype)                                       # (5, 2C, C)
    b_s1 = jnp.concatenate([b11, b21], axis=0).reshape(2 * C, 1)       # (2C, 1) f32

    return dict(
        # raw (for the JAX reference)
        w11=w11, b11=b11, w12=w12, b12=b12, w21=w21, b21=b21, w22=w22, b22=b22,
        wc1=wc1, bc1=bc1, wc2=wc2, bc2=bc2,
        # packed (for the Pallas kernels)
        w_s1=w_s1, b_s1=b_s1,
        w_12=jnp.stack(w12t, axis=0).astype(mxu_dtype), b_12=b12.reshape(C, 1),
        w_22=jnp.stack(w22t, axis=0).astype(mxu_dtype), b_22=b22.reshape(C, 1),
        w_c1=wc1, b_c1=bc1.reshape(Cr, 1),
        w_c2=wc2, b_c2=bc2.reshape(C, 1),
    )


if __name__ == "__main__":
    key = jax.random.PRNGKey(0)
    kp, kx, kf = jax.random.split(key, 3)

    N, C, H, W = 2, 32, 16, 16            # C must be >= 16 (CWR uses C // 16)
    params = init_params(kp, C)

    x = jax.random.normal(kx, (N, C, H, W), jnp.float32)
    f = jax.random.normal(kf, (N, C, H, W), jnp.float32)

    ref = ref_sscr(x, f, params)

    # 2 strips per image -> exercises the halo / strip-seam path.
    out_strips = jax.block_until_ready(sscr_forward(x, f, params, strip_rows=8))
    # auto strip pick (single whole-image strip at this tiny size).
    out_auto = jax.block_until_ready(sscr_forward(x, f, params))

    assert out_strips.shape == ref.shape and out_strips.dtype == ref.dtype
    # tolerance accounts for bf16 MXU operands (accumulation stays f32)
    assert jnp.allclose(out_strips, ref, atol=2e-2, rtol=2e-2), "strip-tiled mismatch"
    assert jnp.allclose(out_auto, ref, atol=2e-2, rtol=2e-2), "auto-tiled mismatch"

    print("KERNEL_OK")
</pallas_src>

<mosaic_0001>
module attributes {stable_mosaic.version = 11 : i64} {
  func.func @_cwr_pool_kernel(%arg0: i32, %arg1: i32, %arg2: memref<1x32x128xf32, #tpu.memory_space<vmem>>, %arg3: memref<1x32x128xf32, #tpu.memory_space<vmem>>, %arg4: memref<2x32xf32, #tpu.memory_space<vmem>>, %arg5: memref<2x1xf32, #tpu.memory_space<vmem>>, %arg6: memref<32x2xf32, #tpu.memory_space<vmem>>, %arg7: memref<32x1xf32, #tpu.memory_space<vmem>>, %arg8: memref<1x32x1xf32, #tpu.memory_space<vmem>>, %arg9: memref<32x1xf32, #tpu.memory_space<vmem>>, %arg10: memref<32x1xf32, #tpu.memory_space<vmem>>) attributes {dimension_semantics = [#tpu.dimension_semantics<parallel>, #tpu.dimension_semantics<arbitrary>], iteration_bounds = array<i64: 2, 2>, scalar_prefetch = 0 : i64, scratch_operands = 2 : i64, tpu.core_type = #tpu.core_type<tc>, window_params = [{transform_indices = @transform_0, window_bounds = array<i64: 1, 32, 128>}, {transform_indices = @transform_1, window_bounds = array<i64: 1, 32, 128>}, {pipeline_mode = #tpu.pipeline_mode<synchronous>, transform_indices = @transform_2, window_bounds = array<i64: 2, 32>}, {pipeline_mode = #tpu.pipeline_mode<synchronous>, transform_indices = @transform_3, window_bounds = array<i64: 2, 1>}, {pipeline_mode = #tpu.pipeline_mode<synchronous>, transform_indices = @transform_4, window_bounds = array<i64: 32, 2>}, {pipeline_mode = #tpu.pipeline_mode<synchronous>, transform_indices = @transform_5, window_bounds = array<i64: 32, 1>}, {transform_indices = @transform_6, window_bounds = array<i64: 1, 32, 1>}]} {
    %c0_i32 = arith.constant 0 : i32
    %0 = arith.cmpi eq, %arg1, %c0_i32 : i32
    %1 = arith.extui %0 : i1 to i32
    %c0_i32_0 = arith.constant 0 : i32
    %2 = arith.cmpi ne, %1, %c0_i32_0 : i32
    scf.if %2 {
      %cst_16 = arith.constant 0.000000e+00 : f32
      %21 = vector.broadcast %cst_16 : f32 to vector<32x1xf32>
      %c0_17 = arith.constant 0 : index
      %c0_18 = arith.constant 0 : index
      %22 = vector.load %arg9[%c0_17, %c0_18] : memref<32x1xf32, #tpu.memory_space<vmem>>, vector<32x1xf32>
      tpu.vector_store %arg9[%c0_17, %c0_18], %21 {strides = array<i32>} : memref<32x1xf32, #tpu.memory_space<vmem>>, vector<32x1xf32>,
      %cst_19 = arith.constant 0xFF800000 : f32
      %23 = vector.broadcast %cst_19 : f32 to vector<32x1xf32>
      %c0_20 = arith.constant 0 : index
      %c0_21 = arith.constant 0 : index
      %24 = vector.load %arg10[%c0_20, %c0_21] : memref<32x1xf32, #tpu.memory_space<vmem>>, vector<32x1xf32>
      tpu.vector_store %arg10[%c0_20, %c0_21], %23 {strides = array<i32>} : memref<32x1xf32, #tpu.memory_space<vmem>>, vector<32x1xf32>,
    } else {
    }
    %c0 = arith.constant 0 : index
    %c0_1 = arith.constant 0 : index
    %c0_2 = arith.constant 0 : index
    %3 = vector.load %arg2[%c0, %c0_1, %c0_2] : memref<1x32x128xf32, #tpu.memory_space<vmem>>, vector<1x32x128xf32>
    %4 = vector.shape_cast %3 : vector<1x32x128xf32> to vector<32x128xf32>
    %c0_3 = arith.constant 0 : index
    %c0_4 = arith.constant 0 : index
    %c0_5 = arith.constant 0 : index
    %5 = vector.load %arg3[%c0_3, %c0_4, %c0_5] : memref<1x32x128xf32, #tpu.memory_space<vmem>>, vector<1x32x128xf32>
    %6 = vector.shape_cast %5 : vector<1x32x128xf32> to vector<32x128xf32>
    %7 = arith.addf %4, %6 : vector<32x128xf32>
    %c0_6 = arith.constant 0 : index
    %c0_7 = arith.constant 0 : index
    %8 = vector.load %arg9[%c0_6, %c0_7] : memref<32x1xf32, #tpu.memory_space<vmem>>, vector<32x1xf32>
    %cst = arith.constant dense<0.000000e+00> : vector<32xf32>
    %9 = vector.multi_reduction <add>, %7, %cst [1] : vector<32x128xf32> to vector<32xf32>
    %10 = vector.shape_cast %9 : vector<32xf32> to vector<32x1xf32>
    %11 = arith.addf %8, %10 : vector<32x1xf32>
    %c0_8 = arith.constant 0 : index
    %c0_9 = arith.constant 0 : index
    %12 = vector.load %arg9[%c0_8, %c0_9] : memref<32x1xf32, #tpu.memory_space<vmem>>, vector<32x1xf32>
    tpu.vector_store %arg9[%c0_8, %c0_9], %11 {strides = array<i32>} : memref<32x1xf32, #tpu.memory_space<vmem>>, vector<32x1xf32>,
    %c0_10 = arith.constant 0 : index
    %c0_11 = arith.constant 0 : index
    %13 = vector.load %arg10[%c0_10, %c0_11] : memref<32x1xf32, #tpu.memory_space<vmem>>, vector<32x1xf32>
    %cst_12 = arith.constant dense<0xFF800000> : vector<32xf32>
    %14 = vector.multi_reduction <maximumf>, %7, %cst_12 [1] : vector<32x128xf32> to vector<32xf32>
    %15 = vector.shape_cast %14 : vector<32xf32> to vector<32x1xf32>
    %16 = arith.maximumf %13, %15 : vector<32x1xf32>
    %c0_13 = arith.constant 0 : index
    %c0_14 = arith.constant 0 : index
    %17 = vector.load %arg10[%c0_13, %c0_14] : memref<32x1xf32, #tpu.memory_space<vmem>>, vector<32x1xf32>
    tpu.vector_store %arg10[%c0_13, %c0_14], %16 {strides = array<i32>} : memref<32x1xf32, #tpu.memory_space<vmem>>, vector<32x1xf32>,
    %c1_i32 = arith.constant 1 : i32
    %18 = arith.cmpi eq, %arg1, %c1_i32 : i32
    %19 = arith.extui %18 : i1 to i32
    %c0_i32_15 = arith.constant 0 : i32
    %20 = arith.cmpi ne, %19, %c0_i32_15 : i32
    scf.if %20 {
      %c0_16 = arith.constant 0 : index
      %c0_17 = arith.constant 0 : index
      %21 = vector.load %arg9[%c0_16, %c0_17] : memref<32x1xf32, #tpu.memory_space<vmem>>, vector<32x1xf32>
      %cst_18 = arith.constant 3.906250e-03 : f32
      %22 = vector.broadcast %cst_18 : f32 to vector<32x1xf32>
      %23 = arith.mulf %21, %22 : vector<32x1xf32>
      %c0_19 = arith.constant 0 : index
      %c0_20 = arith.constant 0 : index
      %24 = vector.load %arg10[%c0_19, %c0_20] : memref<32x1xf32, #tpu.memory_space<vmem>>, vector<32x1xf32>
      %25 = tpu.concatenate %23, %24 in 1 : vector<32x1xf32>, vector<32x1xf32> -> vector<32x2xf32>
      %c0_21 = arith.constant 0 : index
      %c0_22 = arith.constant 0 : index
      %26 = vector.load %arg4[%c0_21, %c0_22] : memref<2x32xf32, #tpu.memory_space<vmem>>, vector<2x32xf32>
      %cst_23 = arith.constant dense<0.000000e+00> : vector<2x2xf32>
      %27 = tpu.matmul %26, %25, %cst_23 {dimension_numbers = #tpu.dot_dimension_numbers<[1], [0], [0], [1], [0, 0, 1, 1], [], []>} : vector<2x32xf32>, vector<32x2xf32>, vector<2x2xf32> -> vector<2x2xf32>
      %c0_24 = arith.constant 0 : index
      %c0_25 = arith.constant 0 : index
      %28 = vector.load %arg5[%c0_24, %c0_25] : memref<2x1xf32, #tpu.memory_space<vmem>>, vector<2x1xf32>
      %29 = vector.broadcast %28 : vector<2x1xf32> to vector<2x2xf32>
      %30 = arith.addf %27, %29 : vector<2x2xf32>
      %cst_26 = arith.constant 0.000000e+00 : f32
      %31 = vector.broadcast %cst_26 : f32 to vector<2x2xf32>
      %32 = arith.maximumf %30, %31 : vector<2x2xf32>
      %c0_27 = arith.constant 0 : index
      %c0_28 = arith.constant 0 : index
      %33 = vector.load %arg6[%c0_27, %c0_28] : memref<32x2xf32, #tpu.memory_space<vmem>>, vector<32x2xf32>
      %cst_29 = arith.constant dense<0.000000e+00> : vector<32x2xf32>
      %34 = tpu.matmul %33, %32, %cst_29 {dimension_numbers = #tpu.dot_dimension_numbers<[1], [0], [0], [1], [0, 0, 1, 1], [], []>} : vector<32x2xf32>, vector<2x2xf32>, vector<32x2xf32> -> vector<32x2xf32>
      %c0_30 = arith.constant 0 : index
      %c0_31 = arith.constant 0 : index
      %35 = vector.load %arg7[%c0_30, %c0_31] : memref<32x1xf32, #tpu.memory_space<vmem>>, vector<32x1xf32>
      %36 = vector.broadcast %35 : vector<32x1xf32> to vector<32x2xf32>
      %37 = arith.addf %34, %36 : vector<32x2xf32>
      %38 = vector.extract_strided_slice %37 {offsets = [0, 0], sizes = [32, 1], strides = [1, 1]} : vector<32x2xf32> to vector<32x1xf32>
      %39 = vector.extract_strided_slice %37 {offsets = [0, 1], sizes = [32, 1], strides = [1, 1]} : vector<32x2xf32> to vector<32x1xf32>
      %40 = arith.addf %38, %39 : vector<32x1xf32>
      %41 = arith.negf %40 : vector<32x1xf32>
      %42 = math.exp %41 : vector<32x1xf32>
      %cst_32 = arith.constant 1.000000e+00 : f32
      %43 = vector.broadcast %cst_32 : f32 to vector<32x1xf32>
      %44 = arith.addf %43, %42 : vector<32x1xf32>
      %45 = arith.divf %43, %44 : vector<32x1xf32>
      %c0_33 = arith.constant 0 : index
      %c0_34 = arith.constant 0 : index
      %c0_35 = arith.constant 0 : index
      %46 = vector.load %arg8[%c0_33, %c0_34, %c0_35] : memref<1x32x1xf32, #tpu.memory_space<vmem>>, vector<1x32x1xf32>
      %47 = vector.shape_cast %46 : vector<1x32x1xf32> to vector<32x1xf32>
      %48 = vector.shape_cast %45 : vector<32x1xf32> to vector<1x32x1xf32>
      tpu.vector_store %arg8[%c0_33, %c0_34, %c0_35], %48 {strides = array<i32>} : memref<1x32x1xf32, #tpu.memory_space<vmem>>, vector<1x32x1xf32>,
    } else {
    }
    return
  }
  func.func @transform_0(%arg0: i32, %arg1: i32) -> (i32, i32, i32) {
    %c0_i32 = arith.constant 0 : i32
    %c0_i32_0 = arith.constant 0 : i32
    return %arg0, %c0_i32, %arg1 : i32, i32, i32
  }
  func.func @transform_1(%arg0: i32, %arg1: i32) -> (i32, i32, i32) {
    %c0_i32 = arith.constant 0 : i32
    %c0_i32_0 = arith.constant 0 : i32
    return %arg0, %c0_i32, %arg1 : i32, i32, i32
  }
  func.func @transform_2(%arg0: i32, %arg1: i32) -> (i32, i32) {
    %c0_i32 = arith.constant 0 : i32
    %c0_i32_0 = arith.constant 0 : i32
    %c0_i32_1 = arith.constant 0 : i32
    return %c0_i32, %c0_i32_0 : i32, i32
  }
  func.func @transform_3(%arg0: i32, %arg1: i32) -> (i32, i32) {
    %c0_i32 = arith.constant 0 : i32
    %c0_i32_0 = arith.constant 0 : i32
    %c0_i32_1 = arith.constant 0 : i32
    return %c0_i32, %c0_i32_0 : i32, i32
  }
  func.func @transform_4(%arg0: i32, %arg1: i32) -> (i32, i32) {
    %c0_i32 = arith.constant 0 : i32
    %c0_i32_0 = arith.constant 0 : i32
    %c0_i32_1 = arith.constant 0 : i32
    return %c0_i32, %c0_i32_0 : i32, i32
  }
  func.func @transform_5(%arg0: i32, %arg1: i32) -> (i32, i32) {
    %c0_i32 = arith.constant 0 : i32
    %c0_i32_0 = arith.constant 0 : i32
    %c0_i32_1 = arith.constant 0 : i32
    return %c0_i32, %c0_i32_0 : i32, i32
  }
  func.func @transform_6(%arg0: i32, %arg1: i32) -> (i32, i32, i32) {
    %c0_i32 = arith.constant 0 : i32
    %c0_i32_0 = arith.constant 0 : i32
    %c0_i32_1 = arith.constant 0 : i32
    return %arg0, %c0_i32, %c0_i32_0 : i32, i32, i32
  }
}

</mosaic_0001>

<bundles_post_ra>
// kernel: tpu_custom_call.1
= control target key start
LH: loop header
LB: loop body
LE: loop exit
PB: predicated region body
PF: predicated region fallthrough
CT: control target
= control target key end

     0   :  { %s1441_s0 = inlined_call_operand.hbm [shape: f32[2,32,256], index: 0, kind: input, shape index: {}]   ;;  %s1442_s1 = inlined_call_operand.hbm [shape: f32[2,32,256], index: 1, kind: input, shape index: {}]   ;;  %s1443_s2 = inlined_call_operand.vmem [shape: f32[2,32], index: 2, kind: input, shape index: {}]   ;;  %s1444_s3 = inlined_call_operand.vmem [shape: f32[2,1], index: 3, kind: input, shape index: {}]   ;;  %s1445_s4 = inlined_call_operand.vmem [shape: f32[32,2], index: 4, kind: input, shape index: {}]   ;;  %s1446_s5 = inlined_call_operand.vmem [shape: f32[32,1], index: 5, kind: input, shape index: {}]   ;;  %s1447_s6 = inlined_call_operand.vmem [shape: f32[2,32,1], index: 6, kind: output, shape index: {}]  }
   0x1   :  { %1454 = sst [smem:[#allocation13_spill]] %s1441_s0 }
   0x2   :  { %11 = vsyncpa [#allocation5], 0 }
   0x3   :  { %13 = vsyncpa [#allocation5 + $0x1], 0 }
   0x4   :  { %14 = vsyncpa [#allocation7], 0 }
   0x5   :  { %16 = vsyncpa [#allocation7 + $0x1], 0  ;;  %s1157_s21 = smov 0   ;;  %s1159_s22 = smov 0  }
   0x6   :  { %s1161_s23 = smov 0   ;;  %s1163_s24 = smov 0  }
   0x7   :  { %s1165_s25 = smov 0   ;;  %s1167_s26 = smov 0  }
   0x8   :  { %s1169_s27 = smov 0   ;;  %s1171_s28 = smov 0  }
   0x9 LB: > { %1455 = sst [smem:[#allocation10_spill]] %s1103_s27  ;;  %s797_s29 = sadd.s32 4294967295, %s1107_s28   ;;  %s1107_s28 = sphi %s1171_s28, %s22_s28   ;;  %s1103_s27 = sphi %s1169_s27, %s1469_s27   ;;  %s1099_s26 = sphi %s1167_s26, %s1474_s26   ;;  %s1095_s25 = sphi %s1165_s25, %s1467_s25   ;;  %s1091_s24 = sphi %s1163_s24, %s1473_s24   ;;  %s1087_s23 = sphi %s1161_s23, %s1472_s23   ;;  %s1083_s22 = sphi %s1159_s22, %s1471_s22   ;;  %s1079_s21 = sphi %s1157_s21, %s1470_s21  }
   0xa   : > { %s31_s30 = sadd.s32 1, %s1099_s26  ;;  %s34_s7 = sadd.s32 1, %s1103_s27 }
   0xb   : > { %p32_p0 = scmp.ge.s32.totalorder %s31_s30, 2  ;;  %s43_s8 = sadd.s32 1, %s1087_s23 }
   0xc   : > { %p50_p1 = scmp.ne.s32.totalorder %s1087_s23, %s1083_s22  ;;  %p51_p2 = scmp.eq.s32.totalorder %s1107_s28, 0 }
   0xd   : > { %s1476_s30 = smov (%p32_p0, %s31_s30), 0  ;;  %s1478_s7 = smov (!%p32_p0, %s34_s7), %s1103_s27 }
   0xe   : > { %1456 = sst [smem:[#allocation11_spill]] %s1476_s30  ;;  %s39_s9 = ssub.s32 %s1099_s26, %s1476_s30 }
   0xf   : > { %p36_p3 = scmp.ge.s32.totalorder %s1478_s7, 2  ;;  %p56_p4 = scmp.ne.s32.totalorder %s1083_s22, %s1079_s21 }
  0x10   : > { %p1208_p5 = por %p51_p2, %p50_p1  ;;  %p57_p6 = scmp.eq.s32.totalorder %s797_s29, 0 }
  0x11   : > { %s1480_s7 = smov (%p36_p3, %s1478_s7), 0  ;;  %p873_p8 = scmp.lt.s32.totalorder %s1107_s28, 4 }
  0x12   : > { %1458 = sst [smem:[#allocation12_spill]] %s1480_s7  ;;  %p1214_p7 = por %p57_p6, %p56_p4 }
  0x13   : > { %s38_s12 = ssub.s32 %s1103_s27, %s1480_s7  ;;  %s1222_s14 = sand.u32 1, %s1087_s23  }
  0x14   : > { %s1459_s11 = scalar_select %p1214_p7, 1, 0 }
  0x15   : > { %s40_s13 = sor.u32 %s39_s9, %s38_s12  ;;  %s1448_s15 = sshll.u32 %s1222_s14, 5 }
  0x16   : > { %p41_p9 = scmp.eq.s32.totalorder %s40_s13, 0  ;;  %s802_s16 = sshll.u32 %s1103_s27, 3 }
  0x17   : > { %s1230_s18 = sadd.s32 %s1099_s26, %s802_s16  ;;  %s234_s20 = scalar_lea.vmem [#allocation4], %s1448_s15 }
  0x18   : > { %s1227_s17 = scalar_select %p41_p9, %s1087_s23, %s43_s8  }
  0x19   : > { %s1449_s19 = sshll.u32 %s1230_s18, 7  ;;  %s242_s21 = sshll.u32 %s234_s20, 4  ;;  %s1242_s21 = int_to_ptr.vmem [resolvable:$true] %s242_s21 }
  0x1a   : > { %s1460_s0 = sld [smem:[#allocation13_spill]]  ;;  %p1248_p10 = pnand %p873_p8, %p1208_p5 }
  0x1b   : > { %s231_s13 = scalar_lea.sflag [#allocation5], %s1222_s14 }
  0x1c   : > { %p979_p13 = pneg %p1248_p10 }
  0x20   : > { %s1240_s12 = scalar_lea.hbm %s1460_s0, %s1449_s19  ;;  %s982_s10 = scalar_lea.hbm %s1460_s0, 2048 }
  0x21   : > { %s977_s16 = scalar_lea.hbm %s1240_s12, 512  ;;  %p983_p2 = scmp.lt.u32.totalorder %s1240_s12, %s1460_s0 }
  0x22   : > { %p978_p12 = scmp.ne.s32.totalorder %s1240_s12, %s977_s16  ;;  %p984_p3 = scmp.lt.u32.totalorder %s982_s10, %s977_s16 }
  0x23   : > { %p986_p5 = scmp.lt.u32.totalorder %s977_s16, %s1240_s12 }
  0x24   : > { %p980_p0 = pnand %p979_p13, %p978_p12  ;;  %p985_p4 = por %p984_p3, %p983_p2 }
  0x26   : > { %p981_p1 = pneg %p980_p0  ;;  %p987_p6 = por %p986_p5, %p985_p4 }
  0x28   : > { %p988_p8 = pnand %p987_p6, %p981_p1 }
  0x2a   : > { %991 = shalt.err (!%p988_p8)
}
  0x2b   : > { %s992_s19 = scalar_lea.vmem %s1242_s21, 512  ;;  %s1109_s20 = smov [#allocation4]  }
  0x2c   : > { %p993_p9 = scmp.ne.s32.totalorder %s1242_s21, %s992_s19  ;;  %s997_s29 = sshll.u32 %s1109_s20, 4  ;;  %s998_s29 = int_to_ptr.vmem [resolvable:$false] %s997_s29 }
  0x2d   : > { %s999_s15 = scalar_lea.vmem %s998_s29, 1024  ;;  %p1000_p11 = scmp.lt.s32.totalorder %s1242_s21, %s998_s29 }
  0x2e   : > { %p995_p12 = pnand %p993_p9, %p979_p13  ;;  %p1001_p2 = scmp.lt.s32.totalorder %s999_s15, %s992_s19 }
  0x30   : > { %p996_p0 = pneg %p995_p12  ;;  %p1002_p3 = por %p1001_p2, %p1000_p11 }
  0x32   : > { %p1003_p4 = pnand %p1002_p3, %p996_p0 }
  0x34   : > { %1006 = shalt.err (!%p1003_p4)
}
  0x35   : > { %s1110_s16 = smov 256   ;;  %s1111_s10 = smov 128  }
  0x36   : > { %s1112_s9 = smov 8   ;;  %p272_p11 = scmp.lt.s32.totalorder %s1107_s28, 5 }
  0x37   : > { %869 = dma.hbm_to_vmem [thread:$0]  (!%p1248_p10), %s1240_s12, 512, %s1242_s21, %s231_s13, %s1110_s16, %s1111_s10, %s1112_s9  }
  0x38   : > { %s1462_s19 = sshll.u32 %s1230_s18, 7  ;;  %p1463_p1 = scmp.ge.s32.totalorder %s1107_s28, 1 }
  0x39   : > { %s1290_s15 = scalar_lea.hbm %s1442_s1, %s1462_s19  ;;  %s1465_s7 = sshll.u32 %s1222_s14, 5 }
  0x3a   : > { %p1294_p5 = pnand %p1463_p1, %p272_p11  ;;  %s256_s30 = scalar_lea.vmem [#allocation6], %s1465_s7 }
  0x3b   : > { %s264_s27 = sshll.u32 %s256_s30, 4  ;;  %s253_s18 = scalar_lea.sflag [#allocation7], %s1222_s14  ;;  %s1300_s27 = int_to_ptr.vmem [resolvable:$true] %s264_s27 }
  0x3c   : > { %s1007_s21 = scalar_lea.hbm %s1290_s15, 512  ;;  %s1012_s19 = scalar_lea.hbm %s1442_s1, 2048 }
  0x3d   : > { %p1008_p6 = scmp.ne.s32.totalorder %s1290_s15, %s1007_s21  ;;  %p1013_p12 = scmp.lt.u32.totalorder %s1290_s15, %s1442_s1 }
  0x3e   : > { %p1014_p0 = scmp.lt.u32.totalorder %s1012_s19, %s1007_s21  ;;  %p1016_p3 = scmp.lt.u32.totalorder %s1007_s21, %s1290_s15 }
  0x3f   : > { %p1010_p8 = pnand %p1008_p6, %p979_p13 }
  0x40   : > { %p1015_p2 = por %p1014_p0, %p1013_p12 }
  0x41   : > { %p1011_p9 = pneg %p1010_p8 }
  0x42   : > { %p1017_p4 = por %p1016_p3, %p1015_p2 }
  0x44   : > { %p1018_p11 = pnand %p1017_p4, %p1011_p9 }
  0x46   : > { %1021 = shalt.err (!%p1018_p11)
}
  0x47   : > { %s1022_s30 = scalar_lea.vmem %s1300_s27, 512  ;;  %s1113_s7 = smov [#allocation6]  }
  0x48   : > { %p1023_p1 = scmp.ne.s32.totalorder %s1300_s27, %s1022_s30  ;;  %s1027_s12 = sshll.u32 %s1113_s7, 4  ;;  %s1028_s12 = int_to_ptr.vmem [resolvable:$false] %s1027_s12 }
  0x49   : > { %s1029_s13 = scalar_lea.vmem %s1028_s12, 1024  ;;  %p1030_p7 = scmp.lt.s32.totalorder %s1300_s27, %s1028_s12 }
  0x4a   : > { %p1025_p6 = pnand %p1023_p1, %p979_p13  ;;  %p1031_p12 = scmp.lt.s32.totalorder %s1029_s13, %s1022_s30 }
  0x4c   : > { %p1026_p8 = pneg %p1025_p6  ;;  %p1032_p0 = por %p1031_p12, %p1030_p7 }
  0x4e   : > { %p1033_p2 = pnand %p1032_p0, %p1026_p8 }
  0x50   : > { %1036 = shalt.err (!%p1033_p2)
}
  0x51   : > { %872 = dma.hbm_to_vmem [thread:$0]  (!%p1248_p10), %s1290_s15, 512, %s1300_s27, %s253_s18, %s1110_s16, %s1111_s10, %s1112_s9  }
  0x52   : > { %276 = sbr.rel (%p1294_p5) target bundleno = 975 (0x3cf), region = 44  ;;  %s278_s21 = sand.u32 (!%p1294_p5), 1, %s1083_s22  }
  0x53   : > { %s808_s19 = sshll.u32 (!%p1294_p5), %s278_s21, 5  ;;  %s279_s20 = scalar_lea.sflag (!%p1294_p5), [#allocation5], %s278_s21 }
  0x54   : > { %s1334_s29 = scalar_lea.vmem (!%p1294_p5), [#allocation4], %s808_s19  ;;  %p1466_p7 = scmp.ne.s32.totalorder (!%p1294_p5), %s1459_s11, 0 }
  0x59   : > { %1070 = dma.done.wait (%p1466_p7), %s279_s20, 512  }
  0x5a   : > { %1072 = vsyncadd (%p1466_p7), %s279_s20, 4294966784  ;;  %s288_s14 = scalar_lea.sflag [#allocation7], %s278_s21  ;;  %s1340_s8 = scalar_lea.vmem [#allocation6], %s808_s19 }
  0x5b   : > { %1074 = dma.done.wait (%p1466_p7), %s288_s14, 512  }
  0x5c   : > { %1076 = vsyncadd (%p1466_p7), %s288_s14, 4294966784  ;;  %p325_p10 = scmp.lt.s32.totalorder %s1095_s25, 1  ;;  %p812_p13 = scmp.ne.s32.totalorder %s1091_s24, 0 }
  0x5d   : > { %vm334_vm0 = vcmask (!%p812_p13), 7168   ;;  %v1114_v0 = vmov (!%p812_p13), 0.0   ;;  %v1115_v1 = vmov (!%p812_p13), -inf  }
  0x5e   : > { %s1482_s25 = smov (!%p325_p10, %s1095_s25), 1  ;;  %333 = sbr.rel (%p812_p13) target bundleno = 101 (0x65), region = 56 }
  0x5f   : > { %s826_s0 = sshll.u32 %s1482_s25, 5  ;;  %335 = vst.msk [vmem:[#allocation2] sm:$0xff] (!%p812_p13), %vm334_vm0, %v1114_v0  ;;  %336 = vst.msk [vmem:[#allocation2 + $0x8] sm:$0xff] (!%p812_p13), %vm334_vm0, %v1114_v0 }
  0x60   : > { %s1351_s10 = scalar_lea.vmem %s1447_s6, %s826_s0  ;;  %337 = vst.msk [vmem:[#allocation2 + $0x10] sm:$0xff] (!%p812_p13), %vm334_vm0, %v1114_v0  ;;  %338 = vst.msk [vmem:[#allocation2 + $0x18] sm:$0xff] (!%p812_p13), %vm334_vm0, %v1114_v0 }
  0x61   : > { %339 = vst.msk [vmem:[#allocation3] sm:$0xff] (!%p812_p13), %vm334_vm0, %v1115_v1  ;;  %340 = vst.msk [vmem:[#allocation3 + $0x8] sm:$0xff] (!%p812_p13), %vm334_vm0, %v1115_v1 }
  0x62   : > { %341 = vst.msk [vmem:[#allocation3 + $0x10] sm:$0xff] (!%p812_p13), %vm334_vm0, %v1115_v1  ;;  %342 = vst.msk [vmem:[#allocation3 + $0x18] sm:$0xff] (!%p812_p13), %vm334_vm0, %v1115_v1 }
  0x65 PF: > { %v345_v2 = vld [vmem:[%s1334_s29 + $0x10] sm:$0xff]  ;;  %v343_v4 = vld [vmem:[%s1334_s29] sm:$0xff]  ;;  %v346_v7 = vld [vmem:[%s1334_s29 + $0x18] sm:$0xff]  ;;  %vm371_vm1 = vcmask 7168   ;;  %p813_p5 = scmp.ne.s32.totalorder %s1091_s24, 1 }
  0x66   : > { %v349_v3 = vld [vmem:[%s1340_s8 + $0x10] sm:$0xff]  ;;  %v347_v6 = vld [vmem:[%s1340_s8] sm:$0xff]  ;;  %v350_v8 = vld [vmem:[%s1340_s8 + $0x18] sm:$0xff]  ;;  %v1116_v43 = vmov (!%p813_p5), 0.0|0.0   ;;  %vm1117_vm2 = vmmov (!%p813_p5), 0   ;;  %v1118_v44 = vmov (!%p813_p5), 0.0  }
  0x67   : > { %v353_v5 = vadd.f32 %v349_v3, %v345_v2  ;;  %v351_v9 = vadd.f32 %v347_v6, %v343_v4  ;;  %v344_v10 = vld [vmem:[%s1334_s29 + $0x8] sm:$0xff]  ;;  %v354_v12 = vadd.f32 %v350_v8, %v346_v7  ;;  %v357_v14 = vld [vmem:[#allocation2 + $0x10] sm:$0xff]  ;;  %v355_v15 = vld [vmem:[#allocation2] sm:$0xff]  ;;  %856 = vmatprep.subr.bf16.mxu0 (!%p813_p5), %v1116_v43  ;;  %845 = vmatprep.mubr.msk.f32.mxu0 (!%p813_p5), %vm1117_vm2, %v1118_v44  ;;  %s1119_s25 = smov (!%p813_p5), 1   ;;  %v1120_v47 = vmov (!%p813_p5), 0   ;;  %s1121_s9 = smov (!%p813_p5), 127  }
  0x68   : > { %v348_v11 = vld [vmem:[%s1340_s8 + $0x8] sm:$0xff]  ;;  %v358_v20 = vld [vmem:[#allocation2 + $0x18] sm:$0xff]  ;;  %v376_v27 = vld [vmem:[#allocation3] sm:$0xff]  ;;  %959 = vset.pattern.permute.xlu1 (!%p813_p5), %v1120_v47  ;;  %960 = vset.pattern.permute.xlu0 (!%p813_p5), %v1120_v47  ;;  %vm439_vm3 = vcmask (!%p813_p5), 261120   ;;  %vm542_vm4 = vcmask (!%p813_p5), 15360   ;;  %vm555_vm5 = vcmask (!%p813_p5), 1041408  }
  0x69   : > { %363 = vadd.xlane.f32.xlu1 %v353_v5  ;;  %359 = vadd.xlane.f32.xlu0 %v351_v9  ;;  %v352_v13 = vadd.f32 %v348_v11, %v344_v10  ;;  %v356_v21 = vld [vmem:[#allocation2 + $0x8] sm:$0xff]  ;;  %v379_v32 = vld [vmem:[#allocation3 + $0x18] sm:$0xff]  ;;  %v378_v33 = vld [vmem:[#allocation3 + $0x10] sm:$0xff] }
  0x6a   : > { %v377_v26 = vld [vmem:[#allocation3 + $0x8] sm:$0xff]  ;;  %v433_v46 = vld [vmem:[%s1444_s3] sm:$0x3] (!%p813_p5)  ;;  %v520_v49 = vld [vmem:[%s1446_s5 + $0x10] sm:$0xff] (!%p813_p5) }
  0x6b   : > { %v518_v48 = vld [vmem:[%s1446_s5] sm:$0xff] (!%p813_p5)  ;;  %v521_v50 = vld [vmem:[%s1446_s5 + $0x18] sm:$0xff] (!%p813_p5) }
  0x6c   : > { %v432_v7 = vld [vmem:[%s1443_s2] sm:$0x3] (!%p813_p5) }
  0x6d   : > { %365 = vadd.xlane.f32.xlu1 %v354_v12  ;;  %361 = vadd.xlane.f32.xlu0 %v352_v13  ;;  %v514_v8 = vld [vmem:[%s1445_s4] sm:$0xff] (!%p813_p5) }
  0x6e   : > { %850 = vmatprep.mubr.msk.f32.mxu1 (!%p813_p5), %vm542_vm4, %v514_v8 }
  0x71   : > { %382 = vmax.xlane.f32.xlu1 %v352_v13  ;;  %380 = vmax.xlane.f32.xlu0 %v351_v9  ;;  %v519_v9 = vld [vmem:[%s1446_s5 + $0x8] sm:$0xff] (!%p813_p5) }
  0x75   : > { %386 = vmax.xlane.f32.xlu1 %v354_v12  ;;  %384 = vmax.xlane.f32.xlu0 %v353_v5 }
  0x86   : > { %436 = vperm.xlu1 (!%p813_p5), %959, %v433_v46  }
  0x8a   : > { %524 = vperm.xlu1 (!%p813_p5), %959, %v518_v48  }
  0x8e   : > { %534 = vperm.xlu1 (!%p813_p5), %959, %v520_v49  }
  0x92   : > { %539 = vperm.xlu1 (!%p813_p5), %959, %v521_v50  }
  0xf6   : > { %v364_v16 = vpop.xlane.xlu1 %363  ;;  %v360_v18 = vpop.xlane.xlu0 %359 }
  0xf7   : > { %v369_v17 = vadd.f32 %v364_v16, %v357_v14  ;;  %v367_v19 = vadd.f32 %v360_v18, %v355_v15  ;;  %v515_v15 = vld [vmem:[%s1445_s4 + $0x8] sm:$0xff] (!%p813_p5)  ;;  %v516_v16 = vld [vmem:[%s1445_s4 + $0x10] sm:$0xff] (!%p813_p5) }
  0xf9   : > { %374 = vst.msk [vmem:[#allocation2 + $0x10] sm:$0xff] %vm371_vm1, %v369_v17  ;;  %372 = vst.msk [vmem:[#allocation2] sm:$0xff] %vm371_vm1, %v367_v19  ;;  %v517_v17 = vld [vmem:[%s1445_s4 + $0x18] sm:$0xff] (!%p813_p5) }
  0xfa   : > { %v366_v22 = vpop.xlane.xlu1 %365  ;;  %v362_v24 = vpop.xlane.xlu0 %361 }
  0xfb   : > { %v370_v23 = vadd.f32 %v366_v22, %v358_v20  ;;  %v368_v25 = vadd.f32 %v362_v24, %v356_v21 }
  0xfd   : > { %375 = vst.msk [vmem:[#allocation2 + $0x18] sm:$0xff] %vm371_vm1, %v370_v23  ;;  %373 = vst.msk [vmem:[#allocation2 + $0x8] sm:$0xff] %vm371_vm1, %v368_v25 }
  0xfe   : > { %v383_v28 = vpop.xlane.xlu1 %382  ;;  %v381_v30 = vpop.xlane.xlu0 %380 }
  0xff   : > { %v389_v29 = vmax.f32 %v377_v26, %v383_v28  ;;  %v388_v31 = vmax.f32 %v376_v27, %v381_v30  ;;  %399 = sbr.rel (%p813_p5) target bundleno = 975 (0x3cf), region = 60 }
 0x100   : > { %v400_v51 = vld [vmem:[#allocation2] sm:$0xff] (!%p813_p5)  ;;  %v402_v56 = vld [vmem:[#allocation2 + $0x10] sm:$0xff] (!%p813_p5) }
 0x101   : > { %393 = vst.msk [vmem:[#allocation3 + $0x8] sm:$0xff] %vm371_vm1, %v389_v29  ;;  %392 = vst.msk [vmem:[#allocation3] sm:$0xff] %vm371_vm1, %v388_v31  ;;  %v404_v53 = vmul.f32 (!%p813_p5), 0.00390625, %v400_v51  ;;  %v406_v60 = vmul.f32 (!%p813_p5), 0.00390625, %v402_v56 }
 0x102   : > { %v387_v34 = vpop.xlane.xlu1 %386  ;;  %v385_v36 = vpop.xlane.xlu0 %384 }
 0x103   : > { %v391_v35 = vmax.f32 %v379_v32, %v387_v34  ;;  %v390_v37 = vmax.f32 %v378_v33, %v385_v36 }
 0x104   : > { %v401_v52 = vld [vmem:[#allocation2 + $0x8] sm:$0xff] (!%p813_p5)  ;;  %v403_v57 = vld [vmem:[#allocation2 + $0x18] sm:$0xff] (!%p813_p5) }
 0x105   : > { %395 = vst.msk [vmem:[#allocation3 + $0x18] sm:$0xff] %vm371_vm1, %v391_v35  ;;  %394 = vst.msk [vmem:[#allocation3 + $0x10] sm:$0xff] %vm371_vm1, %v390_v37  ;;  %v405_v54 = vmul.f32 (!%p813_p5), 0.00390625, %v401_v52  ;;  %v407_v61 = vmul.f32 (!%p813_p5), 0.00390625, %v403_v57 }
 0x106   : > { %v437_v10 = vpop.permute.xlu1 %436 }
 0x108   : > { %v408_v38 = vld [vmem:[#allocation3] sm:$0xff]  ;;  %v409_v39 = vld [vmem:[#allocation3 + $0x8] sm:$0xff] }
 0x109   : > { %v949_v41 = vpack.i.bf16 %v409_v39, %v408_v38 }
 0x10a   : > { %v525_v18 = vpop.permute.xlu1 %524 }
 0x10b   : > { %950 = vrot.lane.b32.xlu0 %v949_v41, %s1119_s25 }
 0x10c   : > { %v410_v40 = vld [vmem:[#allocation3 + $0x10] sm:$0xff]  ;;  %v411_v42 = vld [vmem:[#allocation3 + $0x18] sm:$0xff] }
 0x10d   : > { %v954_v45 = vpack.i.bf16 %v411_v42, %v410_v40 }
 0x10e   : > { %v535_v19 = vpop.permute.xlu1 %534 }
 0x10f   : > { %955 = vrot.lane.b32.xlu0 %v954_v45, %s1119_s25 }
 0x112   : > { %v540_v25 = vpop.permute.xlu1 %539 }
 0x113   : > { %529 = vperm.xlu0 %960, %v519_v9  }
 0x17d   : > { %v951_v55 = vpop.permute.xlu0 %950 }
 0x17e   : > { %v953_v58 = vunpack.i.h.bf16 %v951_v55  ;;  %v952_v59 = vunpack.i.l.bf16 %v951_v55 }
 0x180   : > { %v428_v62 = vsel %vm371_vm1, %v404_v53, %v952_v59  ;;  %v429_v63 = vsel %vm371_vm1, %v405_v54, %v953_v58 }
 0x181   : > { %v956_v0 = vpop.permute.xlu0 %955  ;;  %v857_v1 = vpack.c.bf16 %v429_v63, %v428_v62 }
 0x182   : > { %v958_v2 = vunpack.i.h.bf16 %v956_v0  ;;  %v957_v3 = vunpack.i.l.bf16 %v956_v0 }
 0x183   : > { %858 = vmatpush3.bf16.msra.mxu0 %v857_v1 }
 0x184   : > { %v430_v4 = vsel %vm371_vm1, %v406_v60, %v957_v3  ;;  %v431_v5 = vsel %vm371_vm1, %v407_v61, %v958_v2  ;;  %859 = vmatprep.subr.bf16.mxu0 %v1116_v43 }
 0x185   : > { %v860_v6 = vpack.c.bf16 %v431_v5, %v430_v4 }
 0x187   : > { %861 = vmatpush3.bf16.msra.mxu0 %v860_v6 }
 0x18a   : > { %846 = vmatmul.mubr.msk.f32.vlgmr.msra.gmra.mrb[0].mxu0 %vm439_vm3, %v432_v7 }
 0x192   : > { %v530_v20 = vpop.permute.xlu0 %529 }
 0x25d   : > { %v509_v11 = vpop.f32.mrb[0].mxu0 }
 0x25e   : > { %v510_v12 = vadd.f32 %v509_v11, %v437_v10  ;;  %v847_v13 = vpop.f32.mrb[1].mxu0 }
 0x260   : > { %v513_v14 = vmax.f32 %v510_v12, 0.0 }
 0x262   : > { %848 = vmatprep.subr.msk.mxu1 %vm555_vm5, %v513_v14 }
 0x263   : > { %849 = vmatpush3.msk.msra.mxu1 %vm555_vm5, %v513_v14 }
 0x264   : > { %851 = vmatmul.mubr.msk.f32.vlgmr.msra.gmra.mrb[0].mxu1 %vm542_vm4, %v515_v15 }
 0x265   : > { %853 = vmatprep.mubr.msk.f32.mxu1 %vm542_vm4, %v516_v16 }
 0x268   : > { %854 = vmatmul.mubr.msk.f32.gmra.mrb[2].mxu1 %vm542_vm4, %v517_v17 }
 0x337   : > { %v852_v21 = vpop.f32.mrb[0].mxu1 }
 0x338   : > { %v631_v22 = vadd.f32 %v852_v21, %v530_v20  ;;  %v625_v23 = vpop.f32.mrb[1].mxu1 }
 0x339   : > { %v626_v24 = vadd.f32 %v625_v23, %v525_v18 }
 0x33a   : > { %650 = vrot.lane.b32.xlu1 %v631_v22, %s1121_s9 }
 0x33b   : > { %v855_v26 = vpop.f32.mrb[2].mxu1  ;;  %648 = vrot.lane.b32.xlu0 %v626_v24, %s1121_s9 }
 0x33c   : > { %v641_v27 = vadd.f32 %v855_v26, %v540_v25  ;;  %v635_v28 = vpop.f32.mrb[3].mxu1 }
 0x33d   : > { %v636_v29 = vadd.f32 %v635_v28, %v535_v19 }
 0x33e   : > { %654 = vrot.lane.b32.xlu1 %v641_v27, %s1121_s9 }
 0x33f   : > { %652 = vrot.lane.b32.xlu0 %v636_v29, %s1121_s9 }
 0x3ac   : > { %v651_v30 = vpop.permute.xlu1 %650 }
 0x3ad   : > { %v661_v31 = vadd.f32 %v651_v30, %v631_v22  ;;  %v649_v32 = vpop.permute.xlu0 %648 }
 0x3ae   : > { %v660_v33 = vadd.f32 %v649_v32, %v626_v24 }
 0x3af   : > { %v821_v34 = vmul.f32 -1.442695, %v661_v31 }
 0x3b0   : > { %v820_v35 = vmul.f32 -1.442695, %v660_v33  ;;  %v655_v36 = vpop.permute.xlu1 %654 }
 0x3b1   : > { %961 = vpow2.f32 %v821_v34  ;;  %v663_v37 = vadd.f32 %v655_v36, %v641_v27  ;;  %v653_v38 = vpop.permute.xlu0 %652 }
 0x3b2   : > { %963 = vpow2.f32 %v820_v35  ;;  %v662_v39 = vadd.f32 %v653_v38, %v636_v29 }
 0x3b3   : > { %v823_v40 = vmul.f32 -1.442695, %v663_v37 }
 0x3b4   : > { %v822_v41 = vmul.f32 -1.442695, %v662_v39 }
 0x3b5   : > { %965 = vpow2.f32 %v823_v40 }
 0x3b6   : > { %967 = vpow2.f32 %v822_v41 }
 0x3bb   : > { %v962_v42 = vpop.eup %961 }
 0x3bc   : > { %v964_v43 = vpop.eup %963  ;;  %v677_v44 = vadd.f32 1.0, %v962_v42 }
 0x3bd   : > { %v676_v45 = vadd.f32 1.0, %v964_v43 }
 0x3be   : > { %969 = vrcp.f32 %v677_v44 }
 0x3bf   : > { %v966_v46 = vpop.eup %965  ;;  %971 = vrcp.f32 %v676_v45 }
 0x3c0   : > { %v968_v47 = vpop.eup %967  ;;  %v679_v48 = vadd.f32 1.0, %v966_v46 }
 0x3c1   : > { %v678_v49 = vadd.f32 1.0, %v968_v47 }
 0x3c2   : > { %973 = vrcp.f32 %v679_v48 }
 0x3c3   : > { %975 = vrcp.f32 %v678_v49 }
 0x3c8   : > { %v970_v50 = vpop.eup %969 }
 0x3c9   : > { %v972_v51 = vpop.eup %971  ;;  %689 = vst.msk [vmem:[%s1351_s10 + $0x8] sm:$0xff] %vm371_vm1, %v970_v50 }
 0x3ca   : > { %688 = vst.msk [vmem:[%s1351_s10] sm:$0xff] %vm371_vm1, %v972_v51 }
 0x3cc   : > { %v974_v52 = vpop.eup %973 }
 0x3cd   : > { %v976_v53 = vpop.eup %975  ;;  %691 = vst.msk [vmem:[%s1351_s10 + $0x18] sm:$0xff] %vm371_vm1, %v974_v52 }
 0x3ce   : > { %690 = vst.msk [vmem:[%s1351_s10 + $0x10] sm:$0xff] %vm371_vm1, %v976_v53 }
 0x3cf PF: > { %s22_s28 = sadd.s32 1, %s1107_s28   ;;  %s1467_s25 = sld [smem:[#allocation10_spill]] }
 0x3d0   : > { %p19_p9 = scmp.ge.s32.totalorder %s22_s28, 6   ;;  %s1468_s15 = sld [smem:[#allocation11_spill]] }
 0x3d1   : > { %s1469_s27 = sld [smem:[#allocation12_spill]]  ;;  %s1470_s21 = smov %s1083_s22 }
 0x3d2   : > { %s1471_s22 = smov %s1087_s23  ;;  %s1472_s23 = smov %s1227_s17 }
 0x3d3   : > { %s1473_s24 = smov %s1099_s26  ;;  %21 = sbr.rel (!%p19_p9) target bundleno = 9 (0x9), region = 105 }
 0x3d6   : > { %s1474_s26 = smov %s1468_s15 }
 0x3da   :  { %713 = vsyncpa [#allocation5], 1 }
 0x3db   :  { %715 = vsyncpa [#allocation5 + $0x1], 1 }
 0x3dc   :  { %716 = vsyncpa [#allocation7], 1 }
 0x3dd   :  { %718 = vsyncpa [#allocation7 + $0x1], 1 }

</bundles_post_ra>
